<compile_context>
chip_gen: v6e
topology: v6e:2x2x1
jax: 0.10.0
libtpu: 0.0.40
codegen_flags: <defaults>
</compile_context>

<pallas_src>
import functools
import math

import jax
import jax.numpy as jnp
from jax.experimental import pallas as pl
from jax.experimental.pallas import tpu as pltpu


def _round_up(x, m):
    return ((x + m - 1) // m) * m


def _embed_onehot_kernel(ids_ref, table_ref, out_ref, *, scale, vocab_size):
    # ids_ref   : VMEM (T, 1)   int32  -- token ids for this tile
    # table_ref : VMEM (V, TD)  table dtype -- resident table slab (D-tile)
    # out_ref   : VMEM (T, TD)  table dtype -- dense output slab
    ids = ids_ref[...]                                           # (T, 1)
    t = ids.shape[0]
    col = jax.lax.broadcasted_iota(jnp.int32, (t, vocab_size), 1)
    one_hot = (col == ids).astype(table_ref.dtype)               # (T, V)
    acc = jnp.dot(one_hot, table_ref[...],
                  preferred_element_type=jnp.float32)            # (T, TD) f32
    out_ref[...] = (acc * scale).astype(out_ref.dtype)


def embeddings_forward(ids, table, *, token_tile=128):
    """ids: (B, S) int32, table: (V, D) -> (B, S, D) = table[ids] * sqrt(D)."""
    B, S = ids.shape
    V, D = table.shape
    n = B * S

    flat_ids = ids.reshape(n).astype(jnp.int32)

    # Token tile: multiple of 8 (sublane-dense), capped at token_tile.
    T = min(token_tile, _round_up(n, 8))
    n_pad = _round_up(n, T)
    if n_pad != n:
        flat_ids = jnp.pad(flat_ids, (0, n_pad - n))  # padded rows sliced off below
    ids2d = flat_ids.reshape(n_pad, 1)

    # D tile: lane-dense (multiple of 128) when D is large, else the full D.
    if D % 128 == 0 and D > 512:
        TD = 512
    else:
        TD = D
    grid = (n_pad // T, D // TD)

    scale = math.sqrt(float(D))
    itemsize = jnp.dtype(table.dtype).itemsize

    # VMEM budget: (table slab + out slab + ids) double-buffered. Only raise the
    # scoped limit when the default would be tight.
    block_bytes = (V * TD + T * TD) * itemsize + T * 4
    vmem_limit = None
    if 2 * block_bytes > 24 * 1024 * 1024:
        vmem_limit = min(100 * 1024 * 1024, 2 * block_bytes + 8 * 1024 * 1024)

    cost = pl.CostEstimate(
        flops=2 * n_pad * V * D,                       # one-hot matmul
        transcendentals=0,
        bytes_accessed=(n_pad * 4                      # ids read
                        + V * D * itemsize * grid[0]   # table slab per token tile (worst case)
                        + n_pad * D * itemsize),       # output write
    )

    out = pl.pallas_call(
        functools.partial(_embed_onehot_kernel, scale=scale, vocab_size=V),
        out_shape=jax.ShapeDtypeStruct((n_pad, D), table.dtype),
        grid_spec=pltpu.PrefetchScalarGridSpec(
            num_scalar_prefetch=0,
            grid=grid,
            in_specs=[
                # (T, 1) tile of token ids for this grid step.
                pl.BlockSpec((T, 1), lambda t, d: (t, 0)),
                # Full-vocab slab of the table for this D tile; constant in the
                # token axis -> stays VMEM-resident across token tiles.
                pl.BlockSpec((V, TD), lambda t, d: (0, d)),
            ],
            out_specs=pl.BlockSpec((T, TD), lambda t, d: (t, d)),
        ),
        compiler_params=pltpu.CompilerParams(
            # Every grid step writes a distinct output block -> both axes are
            # safely parallel (enables megacore sharding on v7x).
            dimension_semantics=("parallel", "parallel"),
            vmem_limit_bytes=vmem_limit,
        ),
        cost_estimate=cost,
    )(ids2d, table)

    return out[:n].reshape(B, S, D)


def make_embedding_table(key, vocab_size, d_model, padding_idx):
    """Deterministic synthetic parameters, matching nn.Embedding(..., padding_idx)."""
    table = jax.random.normal(key, (vocab_size, d_model), dtype=jnp.float32)
    # nn.Embedding zeroes the padding_idx row.
    table = table.at[padding_idx].set(0.0)
    return table


if __name__ == "__main__":
    # Small shapes, but with d_model a multiple of 128 so the lane-dense
    # (8, 128)-aligned path is actually exercised.
    vocab_size = 256
    padding_idx = 0
    d_model = 128
    B, S = 2, 16

    key = jax.random.PRNGKey(0)
    k_tab, k_ids = jax.random.split(key)

    table = make_embedding_table(k_tab, vocab_size, d_model, padding_idx)
    ids = jax.random.randint(k_ids, (B, S), 0, vocab_size, dtype=jnp.int32)
    # Make sure the padding token is exercised.
    ids = ids.at[0, 0].set(padding_idx)

    out = embeddings_forward(ids, table)
    out = jax.block_until_ready(out)

    # Reference check (plain JAX).
    ref = table[ids] * math.sqrt(float(d_model))
    assert out.shape == (B, S, d_model)
    assert jnp.allclose(out, ref, atol=1e-5, rtol=1e-5)
    # Padding row must be exactly zero.
    assert jnp.all(out[0, 0] == 0.0)

    print("KERNEL_OK")
</pallas_src>

<mosaic_0001>
module attributes {stable_mosaic.version = 11 : i64} {
  func.func @_embed_onehot_kernel(%arg0: i32, %arg1: i32, %arg2: memref<32x1xi32, #tpu.memory_space<vmem>>, %arg3: memref<256x128xf32, #tpu.memory_space<vmem>>, %arg4: memref<32x128xf32, #tpu.memory_space<vmem>>) attributes {dimension_semantics = [#tpu.dimension_semantics<parallel>, #tpu.dimension_semantics<parallel>], iteration_bounds = array<i64: 1, 1>, scalar_prefetch = 0 : i64, scratch_operands = 0 : i64, tpu.core_type = #tpu.core_type<tc>, window_params = [{transform_indices = @transform_0, window_bounds = array<i64: 32, 1>}, {transform_indices = @transform_1, window_bounds = array<i64: 256, 128>}, {transform_indices = @transform_2, window_bounds = array<i64: 32, 128>}]} {
    %c0 = arith.constant 0 : index
    %c0_0 = arith.constant 0 : index
    %0 = vector.load %arg2[%c0, %c0_0] : memref<32x1xi32, #tpu.memory_space<vmem>>, vector<32x1xi32>
    %1 = tpu.iota {dimensions = array<i32: 1>} : vector<32x256xi32>
    %2 = vector.broadcast %0 : vector<32x1xi32> to vector<32x256xi32>
    %3 = arith.cmpi eq, %1, %2 : vector<32x256xi32>
    %4 = arith.extui %3 : vector<32x256xi1> to vector<32x256xi32>
    %5 = arith.sitofp %4 : vector<32x256xi32> to vector<32x256xf32>
    %c0_1 = arith.constant 0 : index
    %c0_2 = arith.constant 0 : index
    %6 = vector.load %arg3[%c0_1, %c0_2] : memref<256x128xf32, #tpu.memory_space<vmem>>, vector<256x128xf32>
    %cst = arith.constant dense<0.000000e+00> : vector<32x128xf32>
    %7 = tpu.matmul %5, %6, %cst {dimension_numbers = #tpu.dot_dimension_numbers<[1], [0], [0], [1], [0, 0, 1, 1], [], []>} : vector<32x256xf32>, vector<256x128xf32>, vector<32x128xf32> -> vector<32x128xf32>
    %cst_3 = arith.constant 11.3137083 : f32
    %8 = vector.broadcast %cst_3 : f32 to vector<32x128xf32>
    %9 = arith.mulf %7, %8 : vector<32x128xf32>
    %c0_4 = arith.constant 0 : index
    %c0_5 = arith.constant 0 : index
    %10 = vector.load %arg4[%c0_4, %c0_5] : memref<32x128xf32, #tpu.memory_space<vmem>>, vector<32x128xf32>
    tpu.vector_store %arg4[%c0_4, %c0_5], %9 {strides = array<i32>} : memref<32x128xf32, #tpu.memory_space<vmem>>, vector<32x128xf32>,
    return
  }
  func.func @transform_0(%arg0: i32, %arg1: i32) -> (i32, i32) {
    %c0_i32 = arith.constant 0 : i32
    %c0_i32_0 = arith.constant 0 : i32
    return %arg0, %c0_i32 : i32, i32
  }
  func.func @transform_1(%arg0: i32, %arg1: i32) -> (i32, i32) {
    %c0_i32 = arith.constant 0 : i32
    %c0_i32_0 = arith.constant 0 : i32
    return %c0_i32, %arg1 : i32, i32
  }
  func.func @transform_2(%arg0: i32, %arg1: i32) -> (i32, i32) {
    %c0_i32 = arith.constant 0 : i32
    return %arg0, %arg1 : i32, i32
  }
}

</mosaic_0001>

<bundles_post_ra>
// kernel: tpu_custom_call.1
= control target key start
LH: loop header
LB: loop body
LE: loop exit
PB: predicated region body
PF: predicated region fallthrough
CT: control target
= control target key end

     0   :  { %7 = vsyncpa [#allocation3], 0  ;;  %s400_s0 = inlined_call_operand.vmem [shape: s32[32,1], index: 0, kind: input, shape index: {}]   ;;  %s401_s1 = inlined_call_operand.hbm [shape: f32[256,128], index: 1, kind: input, shape index: {}]   ;;  %s402_s2 = inlined_call_operand.hbm [shape: f32[32,128], index: 2, kind: output, shape index: {}]  }
   0x1   :  { %8 = vsyncpa [#allocation4], 0  ;;  %s355_s9 = smov [#allocation2]  }
   0x2   :  { %s16_s10 = sshll.u32 %s355_s9, 4  ;;  %s17_s10 = int_to_ptr.vmem [resolvable:$true] %s16_s10 }
   0x3   :  { %s319_s11 = scalar_lea.vmem %s17_s10, 4096  ;;  %p324_p1 = scmp.lt.s32.totalorder %s17_s10, %s17_s10 }
   0x4   :  { %p320_p0 = scmp.ne.s32.totalorder %s17_s10, %s319_s11  ;;  %p325_p2 = scmp.lt.s32.totalorder %s319_s11, %s319_s11 }
   0x6   :  { %p326_p3 = por %p325_p2, %p324_p1 }
   0x8   :  { %p327_p4 = pnand %p326_p3, %p320_p0 }
   0xa   :  { %330 = shalt.err (!%p327_p4)
}
   0xb   :  { %s356_s12 = smov 128   ;;  %s357_s13 = smov 8  }
   0xc   :  { %22 = dma.hbm_to_vmem [thread:$0]  %s401_s1, 4096, %s17_s10, [#allocation3], %s356_s12, %s356_s12, %s357_s13  }
   0xd   :  { %351 = dma.done.wait [#allocation3], 4096  }
   0xe   :  { %352 = vsyncadd [#allocation3], 4294963200  ;;  %v358_v0 = vmov 0   ;;  %v27_v1 = vld [vmem:[%s400_s0 + $0x8] sm:$0xff]  ;;  %v26_v2 = vld [vmem:[%s400_s0] sm:$0xff]  ;;  %v30_v37 = vlaneseq  ;;  %v359_v42 = vmov 1.0  }
   0xf   :  { %310 = vset.pattern.permute.xlu1 %v358_v0  ;;  %309 = vset.pattern.permute.xlu0 %v358_v0  ;;  %v100_v3 = vld [vmem:[#allocation2 + $0xf8] sm:$0xff]  ;;  %v28_v6 = vld [vmem:[%s400_s0 + $0x10] sm:$0xff]  ;;  %v98_v9 = vld [vmem:[#allocation2 + $0xe8] sm:$0xff] }
  0x10   :  { %37 = vperm.xlu1 %310, %v27_v1   ;;  %34 = vperm.xlu0 %309, %v26_v2   ;;  %v84_v4 = vld [vmem:[#allocation2 + $0x78] sm:$0xff]  ;;  %v99_v7 = vld [vmem:[#allocation2 + $0xf0] sm:$0xff]  ;;  %v82_v10 = vld [vmem:[#allocation2 + $0x68] sm:$0xff]  ;;  %v31_v38 = vand.u32 127, %v30_v37 }
  0x11   :  { %v29_v5 = vld [vmem:[%s400_s0 + $0x18] sm:$0xff]  ;;  %227 = vmatprep.subr.mxu0 %v100_v3  ;;  %271 = vmatprep.subr.mxu1 %v100_v3  ;;  %v83_v8 = vld [vmem:[#allocation2 + $0x70] sm:$0xff]  ;;  %v97_v11 = vld [vmem:[#allocation2 + $0xe0] sm:$0xff]  ;;  %s360_s0 = smov [#allocation5]  }
  0x12   :  { %228 = vmatpush3.msra.mxu0 %v84_v4  ;;  %287 = vmatpush3.msra.mxu1 %v84_v4  ;;  %v81_v12 = vld [vmem:[#allocation2 + $0x60] sm:$0xff]  ;;  %v96_v13 = vld [vmem:[#allocation2 + $0xd8] sm:$0xff]  ;;  %v95_v15 = vld [vmem:[#allocation2 + $0xd0] sm:$0xff]  ;;  %v32_v39 = vadd.s32 128, %v31_v38  ;;  %s199_s23 = sshll.u32 %s360_s0, 4  ;;  %s200_s23 = int_to_ptr.vmem [resolvable:$true] %s199_s23 }
  0x13   :  { %229 = vmatprep.subr.mxu0 %v99_v7  ;;  %272 = vmatprep.subr.mxu1 %v99_v7  ;;  %v80_v14 = vld [vmem:[#allocation2 + $0x58] sm:$0xff]  ;;  %v79_v16 = vld [vmem:[#allocation2 + $0x50] sm:$0xff]  ;;  %v94_v17 = vld [vmem:[#allocation2 + $0xc8] sm:$0xff]  ;;  %s331_s24 = scalar_lea.vmem %s200_s23, 512  ;;  %p336_p6 = scmp.lt.s32.totalorder %s200_s23, %s200_s23 }
  0x14   :  { %43 = vperm.xlu1 %310, %v29_v5   ;;  %40 = vperm.xlu0 %309, %v28_v6   ;;  %v78_v18 = vld [vmem:[#allocation2 + $0x48] sm:$0xff]  ;;  %v93_v19 = vld [vmem:[#allocation2 + $0xc0] sm:$0xff]  ;;  %v92_v21 = vld [vmem:[#allocation2 + $0xb8] sm:$0xff]  ;;  %p332_p5 = scmp.ne.s32.totalorder %s200_s23, %s331_s24  ;;  %p337_p7 = scmp.lt.s32.totalorder %s331_s24, %s331_s24 }
  0x15   :  { %230 = vmatpush3.msra.mxu0 %v83_v8  ;;  %288 = vmatpush3.msra.mxu1 %v83_v8  ;;  %v77_v20 = vld [vmem:[#allocation2 + $0x40] sm:$0xff]  ;;  %v76_v22 = vld [vmem:[#allocation2 + $0x38] sm:$0xff]  ;;  %v91_v23 = vld [vmem:[#allocation2 + $0xb0] sm:$0xff] }
  0x16   :  { %231 = vmatprep.subr.mxu0 %v98_v9  ;;  %273 = vmatprep.subr.mxu1 %v98_v9  ;;  %v75_v24 = vld [vmem:[#allocation2 + $0x30] sm:$0xff]  ;;  %v90_v25 = vld [vmem:[#allocation2 + $0xa8] sm:$0xff]  ;;  %v89_v27 = vld [vmem:[#allocation2 + $0xa0] sm:$0xff]  ;;  %p338_p8 = por %p337_p7, %p336_p6 }
  0x17   :  { %232 = vmatpush3.msra.mxu0 %v82_v10  ;;  %289 = vmatpush3.msra.mxu1 %v82_v10  ;;  %v74_v26 = vld [vmem:[#allocation2 + $0x28] sm:$0xff]  ;;  %v73_v28 = vld [vmem:[#allocation2 + $0x20] sm:$0xff]  ;;  %v88_v29 = vld [vmem:[#allocation2 + $0x98] sm:$0xff] }
  0x18   :  { %233 = vmatprep.subr.mxu0 %v97_v11  ;;  %274 = vmatprep.subr.mxu1 %v97_v11  ;;  %v72_v30 = vld [vmem:[#allocation2 + $0x18] sm:$0xff]  ;;  %v87_v31 = vld [vmem:[#allocation2 + $0x90] sm:$0xff]  ;;  %v86_v33 = vld [vmem:[#allocation2 + $0x88] sm:$0xff]  ;;  %p339_p9 = pnand %p338_p8, %p332_p5 }
  0x19   :  { %234 = vmatpush3.msra.mxu0 %v81_v12  ;;  %290 = vmatpush3.msra.mxu1 %v81_v12  ;;  %v71_v32 = vld [vmem:[#allocation2 + $0x10] sm:$0xff]  ;;  %v70_v34 = vld [vmem:[#allocation2 + $0x8] sm:$0xff]  ;;  %v85_v35 = vld [vmem:[#allocation2 + $0x80] sm:$0xff] }
  0x1a   :  { %235 = vmatprep.subr.mxu0 %v96_v13  ;;  %275 = vmatprep.subr.mxu1 %v96_v13  ;;  %v69_v36 = vld [vmem:[#allocation2] sm:$0xff] }
  0x1b   :  { %236 = vmatpush3.msra.mxu0 %v80_v14  ;;  %291 = vmatpush3.msra.mxu1 %v80_v14 }
  0x1c   :  { %237 = vmatprep.subr.mxu0 %v95_v15  ;;  %276 = vmatprep.subr.mxu1 %v95_v15 }
  0x1d   :  { %238 = vmatpush3.msra.mxu0 %v79_v16  ;;  %292 = vmatpush3.msra.mxu1 %v79_v16 }
  0x1e   :  { %239 = vmatprep.subr.mxu0 %v94_v17  ;;  %277 = vmatprep.subr.mxu1 %v94_v17 }
  0x1f   :  { %240 = vmatpush3.msra.mxu0 %v78_v18  ;;  %293 = vmatpush3.msra.mxu1 %v78_v18 }
  0x20   :  { %241 = vmatprep.subr.mxu0 %v93_v19  ;;  %278 = vmatprep.subr.mxu1 %v93_v19 }
  0x21   :  { %242 = vmatpush3.msra.mxu0 %v77_v20  ;;  %294 = vmatpush3.msra.mxu1 %v77_v20 }
  0x22   :  { %243 = vmatprep.subr.mxu0 %v92_v21  ;;  %279 = vmatprep.subr.mxu1 %v92_v21 }
  0x23   :  { %244 = vmatpush3.msra.mxu0 %v76_v22  ;;  %295 = vmatpush3.msra.mxu1 %v76_v22 }
  0x24   :  { %245 = vmatprep.subr.mxu0 %v91_v23  ;;  %280 = vmatprep.subr.mxu1 %v91_v23 }
  0x25   :  { %246 = vmatpush3.msra.mxu0 %v75_v24  ;;  %296 = vmatpush3.msra.mxu1 %v75_v24 }
  0x26   :  { %247 = vmatprep.subr.mxu0 %v90_v25  ;;  %281 = vmatprep.subr.mxu1 %v90_v25 }
  0x27   :  { %248 = vmatpush3.msra.mxu0 %v74_v26  ;;  %297 = vmatpush3.msra.mxu1 %v74_v26 }
  0x28   :  { %249 = vmatprep.subr.mxu0 %v89_v27  ;;  %282 = vmatprep.subr.mxu1 %v89_v27 }
  0x29   :  { %250 = vmatpush3.msra.mxu0 %v73_v28  ;;  %298 = vmatpush3.msra.mxu1 %v73_v28 }
  0x2a   :  { %251 = vmatprep.subr.mxu0 %v88_v29  ;;  %283 = vmatprep.subr.mxu1 %v88_v29 }
  0x2b   :  { %252 = vmatpush3.msra.mxu0 %v72_v30  ;;  %299 = vmatpush3.msra.mxu1 %v72_v30 }
  0x2c   :  { %253 = vmatprep.subr.mxu0 %v87_v31  ;;  %284 = vmatprep.subr.mxu1 %v87_v31 }
  0x2d   :  { %254 = vmatpush3.msra.mxu0 %v71_v32  ;;  %300 = vmatpush3.msra.mxu1 %v71_v32 }
  0x2e   :  { %255 = vmatprep.subr.mxu0 %v86_v33  ;;  %285 = vmatprep.subr.mxu1 %v86_v33 }
  0x2f   :  { %256 = vmatpush3.msra.mxu0 %v70_v34  ;;  %301 = vmatpush3.msra.mxu1 %v70_v34 }
  0x30   :  { %257 = vmatprep.subr.mxu0 %v85_v35  ;;  %286 = vmatprep.subr.mxu1 %v85_v35 }
  0x31   :  { %258 = vmatpush3.msra.mxu0 %v69_v36  ;;  %302 = vmatpush3.msra.mxu1 %v69_v36 }
  0x8b   :  { %v38_v40 = vpop.permute.xlu1 %37  ;;  %v35_v41 = vpop.permute.xlu0 %34 }
  0x8c   :  { %vm48_vm0 = vcmp.eq.s32.totalorder %v32_v39, %v38_v40  ;;  %vm45_vm1 = vcmp.eq.s32.totalorder %v31_v38, %v35_v41  ;;  %vm46_vm2 = vcmp.eq.s32.totalorder %v32_v39, %v35_v41  ;;  %vm47_vm3 = vcmp.eq.s32.totalorder %v31_v38, %v38_v40 }
  0x8d   :  { %219 = vmatprep.mubr.msk.f32.mxu0 %vm46_vm2, %v359_v42 }
  0x8e   :  { %220 = vmatmul.mubr.msk.f32.vlgmr.msra.gmra.mxu0 %vm45_vm1, %v359_v42 }
  0x8f   :  { %v44_v43 = vpop.permute.xlu1 %43  ;;  %v41_v44 = vpop.permute.xlu0 %40  ;;  %221 = vmatprep.mubr.msk.f32.mxu0 %vm48_vm0, %v359_v42 }
  0x90   :  { %vm49_vm4 = vcmp.eq.s32.totalorder %v31_v38, %v41_v44  ;;  %vm50_vm5 = vcmp.eq.s32.totalorder %v32_v39, %v41_v44  ;;  %vm52_vm6 = vcmp.eq.s32.totalorder %v32_v39, %v44_v43  ;;  %vm51_vm7 = vcmp.eq.s32.totalorder %v31_v38, %v44_v43 }
  0x91   :  { %223 = vmatprep.mubr.msk.f32.mxu1 %vm50_vm5, %v359_v42 }
  0x92   :  { %222 = vmatmul.mubr.msk.f32.gmra.mxu0 %vm47_vm3, %v359_v42  ;;  %224 = vmatmul.mubr.msk.f32.vlgmr.msra.gmra.mxu1 %vm49_vm4, %v359_v42 }
  0x93   :  { %225 = vmatprep.mubr.msk.f32.mxu1 %vm52_vm6, %v359_v42 }
  0x96   :  { %226 = vmatmul.mubr.msk.f32.gmra.mxu1 %vm51_vm7, %v359_v42 }
 0x14e   :  { %v259_v45 = vpop.f32.mrf.mxu0 }
 0x150   :  { %v260_v46 = vpop.f32.mrf.mxu0 }
 0x151   :  { %v261_v47 = vadd.f32 %v260_v46, %v259_v45 }
 0x152   :  { %v262_v48 = vpop.f32.mrf.mxu0  ;;  %v265_v49 = vpop.f32.mrf.mxu1 }
 0x153   :  { %v186_v50 = vmul.f32 11.313708, %v261_v47 }
 0x154   :  { %v263_v51 = vpop.f32.mrf.mxu0  ;;  %v266_v52 = vpop.f32.mrf.mxu1 }
 0x155   :  { %190 = vst [vmem:[#allocation5] sm:$0xff] %v186_v50  ;;  %v264_v53 = vadd.f32 %v263_v51, %v262_v48  ;;  %v267_v54 = vadd.f32 %v266_v52, %v265_v49 }
 0x156   :  { %v268_v55 = vpop.f32.mrf.mxu1 }
 0x157   :  { %v187_v56 = vmul.f32 11.313708, %v264_v53  ;;  %v188_v57 = vmul.f32 11.313708, %v267_v54 }
 0x158   :  { %v269_v58 = vpop.f32.mrf.mxu1 }
 0x159   :  { %191 = vst [vmem:[#allocation5 + $0x8] sm:$0xff] %v187_v56  ;;  %192 = vst [vmem:[#allocation5 + $0x10] sm:$0xff] %v188_v57  ;;  %v270_v59 = vadd.f32 %v269_v58, %v268_v55 }
 0x15b   :  { %v189_v60 = vmul.f32 11.313708, %v270_v59 }
 0x15d   :  { %193 = vst [vmem:[#allocation5 + $0x18] sm:$0xff] %v189_v60 }
 0x15e   :  { %342 = shalt.err (!%p339_p9)
}
 0x15f   :  { %205 = dma.vmem_to_hbm [thread:$0]  %s200_s23, 512, %s402_s2, [#allocation4], %s356_s12, %s356_s12, %s357_s13  }
 0x160   :  { %353 = dma.done.wait [#allocation4], 512  }
 0x161   :  { %354 = vsyncadd [#allocation4], 4294966784 }
 0x162   :  { %209 = vsyncpa [#allocation3], 1 }
 0x163   :  { %210 = vsyncpa [#allocation4], 1 }

</bundles_post_ra>
